<compile_context>
chip_gen: v7x
topology: tpu7x:2x2x1
jax: 0.10.0
libtpu: 0.0.40
codegen_flags: <defaults>
</compile_context>

<pallas_src>
import jax
import jax.numpy as jnp
from jax import lax
from jax.experimental import pallas as pl
from jax.experimental.pallas import tpu as pltpu


# -----------------------------------------------------------------------------
# Fused decoder kernels.
#   cur    = tanh(W_wv[prev_id] + ctx @ W_cc + b)   (RGM with prev == 0)
#   logits = cur @ W_fc                             (final_fc, no bias)
# Grid axis j tiles V; `cur` is staged once in a VMEM scratch at j == 0.
# -----------------------------------------------------------------------------
def decoder_kernel_resident_wwv(ids_ref, ctx_ref, wwv_ref, wcc_ref, b_ref,
                                wfc_ref, y_ref, cur_ref):
    @pl.when(pl.program_id(0) == 0)
    def _():
        m = ids_ref.shape[0]
        v = wwv_ref.shape[0]
        # In-kernel "gather": one-hot built from the int32 ids, fed to the MXU.
        onehot = (ids_ref[...] ==
                  lax.broadcasted_iota(jnp.int32, (m, v), 1)).astype(jnp.bfloat16)
        pre = (jnp.dot(onehot, wwv_ref[...], preferred_element_type=jnp.float32)
               + jnp.dot(ctx_ref[...], wcc_ref[...],
                         preferred_element_type=jnp.float32)
               + b_ref[...])                      # f32 bias add
        cur_ref[...] = jnp.tanh(pre).astype(cur_ref.dtype)   # tanh in f32
    # Every j: one lane-dense V tile of logits.
    y_ref[...] = jnp.dot(cur_ref[...], wfc_ref[...],
                         preferred_element_type=jnp.float32)


def decoder_kernel_gathered(wv_ref, ctx_ref, wcc_ref, b_ref,
                            wfc_ref, y_ref, cur_ref):
    # Fallback when W_wv is too big to keep resident: rows gathered in wrapper.
    @pl.when(pl.program_id(0) == 0)
    def _():
        pre = (wv_ref[...].astype(jnp.float32)
               + jnp.dot(ctx_ref[...], wcc_ref[...],
                         preferred_element_type=jnp.float32)
               + b_ref[...])
        cur_ref[...] = jnp.tanh(pre).astype(cur_ref.dtype)
    y_ref[...] = jnp.dot(cur_ref[...], wfc_ref[...],
                         preferred_element_type=jnp.float32)


def decoder_forward(prev_ids, ctx, wwv, wcc, b, wfc):
    """prev_ids: (M,) int32; ctx: (M,H) bf16; wwv: (V,H) bf16; wcc: (H,H) bf16;
       b: (H,) f32; wfc: (H,V) bf16  ->  (M,V) f32 logits."""
    M, H = ctx.shape
    V = wfc.shape[1]
    b2 = b.reshape(1, H).astype(jnp.float32)

    # Lane-dense V tiles; full V at demo size (grid=(1,)), 2048-wide tiles at
    # realistic vocab sizes (2*H*tv bf16 double-buffer + M*tv f32 out block
    # stays well under the 64 MiB v7x VMEM).
    tv = V if V <= 2048 else 2048
    grid = (pl.cdiv(V, tv),)

    cparams = pltpu.CompilerParams(
        dimension_semantics=("arbitrary",),      # cur scratch carried across j
        vmem_limit_bytes=64 * 1024 * 1024,
    )
    scratch = [pltpu.VMEM((M, H), jnp.bfloat16)]  # staged `cur`

    if V * H * 2 <= (4 << 20):
        # W_wv resident in VMEM; ids travel as a tiny (M,1) int32 block.
        return pl.pallas_call(
            decoder_kernel_resident_wwv,
            out_shape=jax.ShapeDtypeStruct((M, V), jnp.float32),
            grid=grid,
            in_specs=[
                pl.BlockSpec((M, 1), lambda j: (0, 0)),    # prev-token ids
                pl.BlockSpec((M, H), lambda j: (0, 0)),    # contexts (bf16)
                pl.BlockSpec((V, H), lambda j: (0, 0)),    # W_wv resident (bf16)
                pl.BlockSpec((H, H), lambda j: (0, 0)),    # W_cc (bf16)
                pl.BlockSpec((1, H), lambda j: (0, 0)),    # bias (f32)
                pl.BlockSpec((H, tv), lambda j: (0, j)),   # W_fc V tile (bf16)
            ],
            out_specs=pl.BlockSpec((M, tv), lambda j: (0, j)),
            scratch_shapes=scratch,
            compiler_params=cparams,
        )(prev_ids.reshape(M, 1).astype(jnp.int32), ctx, wwv, wcc, b2, wfc)

    # Large-V fallback: gather W_wv rows in the wrapper, stream (M,H) bf16.
    wv_rows = jnp.take(wwv, prev_ids, axis=0)
    return pl.pallas_call(
        decoder_kernel_gathered,
        out_shape=jax.ShapeDtypeStruct((M, V), jnp.float32),
        grid=grid,
        in_specs=[
            pl.BlockSpec((M, H), lambda j: (0, 0)),        # gathered W_wv rows
            pl.BlockSpec((M, H), lambda j: (0, 0)),        # contexts
            pl.BlockSpec((H, H), lambda j: (0, 0)),        # W_cc
            pl.BlockSpec((1, H), lambda j: (0, 0)),        # bias
            pl.BlockSpec((H, tv), lambda j: (0, j)),       # W_fc V tile
        ],
        out_specs=pl.BlockSpec((M, tv), lambda j: (0, j)),
        scratch_shapes=scratch,
        compiler_params=cparams,
    )(wv_rows, ctx, wcc, b2, wfc)


# -----------------------------------------------------------------------------
# RCM: recurrent context model (tiny k<=3 step recurrence, 2 layers) — glue.
# (B, k, H) sentence vectors -> (B, L, H) per-position contexts.
# -----------------------------------------------------------------------------
def rcm_forward(svs, p):
    B, k, H = svs.shape
    h1 = jnp.zeros((B, H), jnp.float32)
    h2 = jnp.zeros((B, H), jnp.float32)
    for t in range(k):  # static, k <= 3
        h1 = jnp.tanh(svs[:, t] @ p["rcm_win1"] + h1 @ p["rcm_whh1"] + p["rcm_b1"])
        h2 = jnp.tanh(h1 @ p["rcm_win2"] + h2 @ p["rcm_whh2"] + p["rcm_b2"])
    base = h2 @ p["rcm_wout"] + p["rcm_bout"]                      # (B, H)
    return jnp.tanh(base[:, None, :] + p["rcm_pos"][None, :, :])   # (B, L, H)


# -----------------------------------------------------------------------------
# Parameters (deterministic, synthetic).  Matmul weights of the decoder are
# stored bf16 (MXU-native); everything else stays f32.
# -----------------------------------------------------------------------------
def init_params(key, V, E, H, L):
    ks = jax.random.split(key, 16)
    s = 0.1

    def n(k, shape, dtype=jnp.float32):
        return (jax.random.normal(k, shape, jnp.float32) * s).astype(dtype)

    return dict(
        embedding=n(ks[0], (V, E)),
        csm_w=n(ks[1], (E, H)),
        csm_b=n(ks[2], (H,)),
        rcm_win1=n(ks[3], (H, H)),
        rcm_whh1=n(ks[4], (H, H)),
        rcm_b1=n(ks[5], (H,)),
        rcm_win2=n(ks[6], (H, H)),
        rcm_whh2=n(ks[7], (H, H)),
        rcm_b2=n(ks[8], (H,)),
        rcm_wout=n(ks[9], (H, H)),
        rcm_bout=n(ks[10], (H,)),
        rcm_pos=n(ks[11], (L, H)),
        rgm_wwv=n(ks[12], (V, H), jnp.bfloat16),
        rgm_wcc=n(ks[13], (H, H), jnp.bfloat16),
        rgm_b=n(ks[14], (H,)),
        fc_w=n(ks[15], (H, V), jnp.bfloat16),
    )


# -----------------------------------------------------------------------------
# Net.forward, IsTrain=True.
# TODO(synk): IsTrain=False greedy-decoding branch (data-dependent argmax
#             feedback that rewrites the embedded input) is not implemented.
# -----------------------------------------------------------------------------
def net_forward(p, xidx, L):
    B = xidx.shape[0]
    V, E = p["embedding"].shape
    H = p["csm_w"].shape[1]
    T = 3 * L

    emb = p["embedding"][xidx]                                     # (B, 4L, E)

    # --- CSM: plain jnp (XLA fuses mean+matmul+tanh; no Pallas launch) --------
    seg_means = jnp.mean(emb[:, :3 * L].reshape(B, 3, L, E), axis=2)   # (B,3,E)
    sv_all = jnp.tanh(seg_means.reshape(B * 3, E) @ p["csm_w"] + p["csm_b"])
    sv_all = sv_all.reshape(B, 3, H)
    sv1, sv2, sv3 = sv_all[:, 0], sv_all[:, 1], sv_all[:, 2]

    # --- RCM contexts (glue) ---------------------------------------------------
    ctx1 = rcm_forward(sv1[:, None, :], p)                         # (B, L, H)
    ctx2 = rcm_forward(jnp.stack([sv1, sv2], axis=1), p)           # (B, L, H)
    ctx3 = rcm_forward(jnp.stack([sv1, sv2, sv3], axis=1), p)      # (B, L, H)
    ctx_all = jnp.transpose(
        jnp.concatenate([ctx1, ctx2, ctx3], axis=1), (1, 0, 2))    # (T, B, H)

    # --- prev-token ids (wj one-hot source columns of the reference) ----------
    t_idx = jnp.arange(T)
    prev_ids = xidx[:, t_idx + L - 1].T.reshape(-1)                # (T*B,)

    # --- Fused decoder: one kernel over all T*B rows ---------------------------
    logits = decoder_forward(
        prev_ids,
        ctx_all.reshape(T * B, H).astype(jnp.bfloat16),
        p["rgm_wwv"],
        p["rgm_wcc"],
        p["rgm_b"],
        p["fc_w"],
    )                                                              # (T*B, V)
    y_tbv = logits.reshape(T, B, V)

    # --- Hard one-hot rows at t in {0, L, 2L} (i==0 / i==L / i==2L branches) ---
    first_ids = xidx[:, jnp.array([L, 2 * L, 3 * L])]              # (B, 3)
    onehots = jax.nn.one_hot(first_ids.T, V, dtype=jnp.float32)    # (3, B, V)
    y_tbv = y_tbv.at[jnp.array([0, L, 2 * L])].set(onehots)

    return jnp.transpose(y_tbv, (1, 0, 2))                         # (B, 3L, V)


if __name__ == "__main__":
    B, L, V, E, H = 8, 8, 128, 32, 32   # batch, sentence_len, vocab, embed, hidden
    key = jax.random.PRNGKey(0)
    kp, kx = jax.random.split(key)
    params = init_params(kp, V, E, H, L)
    x = jax.random.randint(kx, (B, 4 * L), 0, V, dtype=jnp.int32)  # token ids

    fwd = jax.jit(net_forward, static_argnums=(2,))
    y = jax.block_until_ready(fwd(params, x, L))
    assert y.shape == (B, 3 * L, V) and y.dtype == jnp.float32
    print("KERNEL_OK")
</pallas_src>

<mosaic_0001>
module attributes {stable_mosaic.version = 11 : i64} {
  func.func @decoder_kernel_resident_wwv(%arg0: i32, %arg1: memref<192x1xi32, #tpu.memory_space<vmem>>, %arg2: memref<192x32xbf16, #tpu.memory_space<vmem>>, %arg3: memref<128x32xbf16, #tpu.memory_space<vmem>>, %arg4: memref<32x32xbf16, #tpu.memory_space<vmem>>, %arg5: memref<1x32xf32, #tpu.memory_space<vmem>>, %arg6: memref<32x128xbf16, #tpu.memory_space<vmem>>, %arg7: memref<192x128xf32, #tpu.memory_space<vmem>>, %arg8: memref<192x32xbf16, #tpu.memory_space<vmem>>) attributes {dimension_semantics = [#tpu.dimension_semantics<arbitrary>], iteration_bounds = array<i64: 1>, scalar_prefetch = 0 : i64, scratch_operands = 1 : i64, tpu.core_type = #tpu.core_type<tc>, window_params = [{pipeline_mode = #tpu.pipeline_mode<synchronous>, transform_indices = @transform_0, window_bounds = array<i64: 192, 1>}, {pipeline_mode = #tpu.pipeline_mode<synchronous>, transform_indices = @transform_1, window_bounds = array<i64: 192, 32>}, {pipeline_mode = #tpu.pipeline_mode<synchronous>, transform_indices = @transform_2, window_bounds = array<i64: 128, 32>}, {pipeline_mode = #tpu.pipeline_mode<synchronous>, transform_indices = @transform_3, window_bounds = array<i64: 32, 32>}, {pipeline_mode = #tpu.pipeline_mode<synchronous>, transform_indices = @transform_4, window_bounds = array<i64: 1, 32>}, {transform_indices = @transform_5, window_bounds = array<i64: 32, 128>}, {transform_indices = @transform_6, window_bounds = array<i64: 192, 128>}]} {
    %c0_i32 = arith.constant 0 : i32
    %0 = arith.cmpi eq, %arg0, %c0_i32 : i32
    %1 = arith.extui %0 : i1 to i32
    %c0_i32_0 = arith.constant 0 : i32
    %2 = arith.cmpi ne, %1, %c0_i32_0 : i32
    scf.if %2 {
      %c0_6 = arith.constant 0 : index
      %c0_7 = arith.constant 0 : index
      %7 = vector.load %arg1[%c0_6, %c0_7] : memref<192x1xi32, #tpu.memory_space<vmem>>, vector<192x1xi32>
      %8 = tpu.iota {dimensions = array<i32: 1>} : vector<192x128xi32>
      %9 = vector.broadcast %7 : vector<192x1xi32> to vector<192x128xi32>
      %10 = arith.cmpi eq, %9, %8 : vector<192x128xi32>
      %11 = arith.extui %10 : vector<192x128xi1> to vector<192x128xi32>
      %12 = arith.sitofp %11 : vector<192x128xi32> to vector<192x128xf32>
      %13 = arith.truncf %12 : vector<192x128xf32> to vector<192x128xbf16>
      %c0_8 = arith.constant 0 : index
      %c0_9 = arith.constant 0 : index
      %14 = vector.load %arg3[%c0_8, %c0_9] : memref<128x32xbf16, #tpu.memory_space<vmem>>, vector<128x32xbf16>
      %cst_10 = arith.constant dense<0.000000e+00> : vector<192x32xf32>
      %15 = tpu.matmul %13, %14, %cst_10 {dimension_numbers = #tpu.dot_dimension_numbers<[1], [0], [0], [1], [0, 0, 1, 1], [], []>} : vector<192x128xbf16>, vector<128x32xbf16>, vector<192x32xf32> -> vector<192x32xf32>
      %c0_11 = arith.constant 0 : index
      %c0_12 = arith.constant 0 : index
      %16 = vector.load %arg2[%c0_11, %c0_12] : memref<192x32xbf16, #tpu.memory_space<vmem>>, vector<192x32xbf16>
      %c0_13 = arith.constant 0 : index
      %c0_14 = arith.constant 0 : index
      %17 = vector.load %arg4[%c0_13, %c0_14] : memref<32x32xbf16, #tpu.memory_space<vmem>>, vector<32x32xbf16>
      %cst_15 = arith.constant dense<0.000000e+00> : vector<192x32xf32>
      %18 = tpu.matmul %16, %17, %cst_15 {dimension_numbers = #tpu.dot_dimension_numbers<[1], [0], [0], [1], [0, 0, 1, 1], [], []>} : vector<192x32xbf16>, vector<32x32xbf16>, vector<192x32xf32> -> vector<192x32xf32>
      %19 = arith.addf %15, %18 : vector<192x32xf32>
      %c0_16 = arith.constant 0 : index
      %c0_17 = arith.constant 0 : index
      %20 = vector.load %arg5[%c0_16, %c0_17] : memref<1x32xf32, #tpu.memory_space<vmem>>, vector<1x32xf32>
      %21 = vector.broadcast %20 : vector<1x32xf32> to vector<192x32xf32>
      %22 = arith.addf %19, %21 : vector<192x32xf32>
      %23 = math.tanh %22 : vector<192x32xf32>
      %24 = arith.truncf %23 : vector<192x32xf32> to vector<192x32xbf16>
      %c0_18 = arith.constant 0 : index
      %c0_19 = arith.constant 0 : index
      %25 = vector.load %arg8[%c0_18, %c0_19] : memref<192x32xbf16, #tpu.memory_space<vmem>>, vector<192x32xbf16>
      tpu.vector_store %arg8[%c0_18, %c0_19], %24 {strides = array<i32>} : memref<192x32xbf16, #tpu.memory_space<vmem>>, vector<192x32xbf16>,
    } else {
    }
    %c0 = arith.constant 0 : index
    %c0_1 = arith.constant 0 : index
    %3 = vector.load %arg8[%c0, %c0_1] : memref<192x32xbf16, #tpu.memory_space<vmem>>, vector<192x32xbf16>
    %c0_2 = arith.constant 0 : index
    %c0_3 = arith.constant 0 : index
    %4 = vector.load %arg6[%c0_2, %c0_3] : memref<32x128xbf16, #tpu.memory_space<vmem>>, vector<32x128xbf16>
    %cst = arith.constant dense<0.000000e+00> : vector<192x128xf32>
    %5 = tpu.matmul %3, %4, %cst {dimension_numbers = #tpu.dot_dimension_numbers<[1], [0], [0], [1], [0, 0, 1, 1], [], []>} : vector<192x32xbf16>, vector<32x128xbf16>, vector<192x128xf32> -> vector<192x128xf32>
    %c0_4 = arith.constant 0 : index
    %c0_5 = arith.constant 0 : index
    %6 = vector.load %arg7[%c0_4, %c0_5] : memref<192x128xf32, #tpu.memory_space<vmem>>, vector<192x128xf32>
    tpu.vector_store %arg7[%c0_4, %c0_5], %5 {strides = array<i32>} : memref<192x128xf32, #tpu.memory_space<vmem>>, vector<192x128xf32>,
    return
  }
  func.func @transform_0(%arg0: i32) -> (i32, i32) {
    %c0_i32 = arith.constant 0 : i32
    %c0_i32_0 = arith.constant 0 : i32
    %c0_i32_1 = arith.constant 0 : i32
    return %c0_i32, %c0_i32_0 : i32, i32
  }
  func.func @transform_1(%arg0: i32) -> (i32, i32) {
    %c0_i32 = arith.constant 0 : i32
    %c0_i32_0 = arith.constant 0 : i32
    %c0_i32_1 = arith.constant 0 : i32
    return %c0_i32, %c0_i32_0 : i32, i32
  }
  func.func @transform_2(%arg0: i32) -> (i32, i32) {
    %c0_i32 = arith.constant 0 : i32
    %c0_i32_0 = arith.constant 0 : i32
    %c0_i32_1 = arith.constant 0 : i32
    return %c0_i32, %c0_i32_0 : i32, i32
  }
  func.func @transform_3(%arg0: i32) -> (i32, i32) {
    %c0_i32 = arith.constant 0 : i32
    %c0_i32_0 = arith.constant 0 : i32
    %c0_i32_1 = arith.constant 0 : i32
    return %c0_i32, %c0_i32_0 : i32, i32
  }
  func.func @transform_4(%arg0: i32) -> (i32, i32) {
    %c0_i32 = arith.constant 0 : i32
    %c0_i32_0 = arith.constant 0 : i32
    %c0_i32_1 = arith.constant 0 : i32
    return %c0_i32, %c0_i32_0 : i32, i32
  }
  func.func @transform_5(%arg0: i32) -> (i32, i32) {
    %c0_i32 = arith.constant 0 : i32
    %c0_i32_0 = arith.constant 0 : i32
    return %c0_i32, %arg0 : i32, i32
  }
  func.func @transform_6(%arg0: i32) -> (i32, i32) {
    %c0_i32 = arith.constant 0 : i32
    %c0_i32_0 = arith.constant 0 : i32
    return %c0_i32, %arg0 : i32, i32
  }
}

</mosaic_0001>

<bundles_post_ra>
// kernel: net_forward.1
= control target key start
LH: loop header
LB: loop body
LE: loop exit
PB: predicated region body
PF: predicated region fallthrough
CT: control target
= control target key end

     0   :  { %11 = vsyncpa [#allocation4], 0  ;;  %s1849_s0 = inlined_call_operand.hbm [shape: s32[192,1], index: 0, kind: input, shape index: {}]   ;;  %s1850_s1 = inlined_call_operand.hbm [shape: bf16[192,32], index: 1, kind: input, shape index: {}]   ;;  %s1851_s2 = inlined_call_operand.hbm [shape: bf16[128,32], index: 2, kind: input, shape index: {}]   ;;  %s1852_s3 = inlined_call_operand.hbm [shape: bf16[32,32], index: 3, kind: input, shape index: {}]   ;;  %s1853_s4 = inlined_call_operand.hbm [shape: f32[1,32], index: 4, kind: input, shape index: {}]   ;;  %s1854_s5 = inlined_call_operand.hbm [shape: bf16[32,128], index: 5, kind: input, shape index: {}]   ;;  %s1855_s6 = inlined_call_operand.hbm [shape: f32[192,128], index: 6, kind: output, shape index: {}]  }
   0x1   :  { %12 = vsyncpa [#allocation7], 0 }
   0x2   :  { %13 = vsyncpa [#allocation10], 0 }
   0x3   :  { %14 = vsyncpa [#allocation13], 0 }
   0x4   :  { %15 = vsyncpa [#allocation5], 0  ;;  %s1587_s21 = smov [#allocation6]   ;;  %s1423_s25 = scalar_lea.hbm %s1850_s1, 1536 }
   0x5   :  { %s33_s22 = sshll.u32 %s1587_s21, 4  ;;  %p1424_p0 = scmp.ne.s32.totalorder %s1850_s1, %s1423_s25  ;;  %s34_s22 = int_to_ptr.vmem [resolvable:$true] %s33_s22 }
   0x6   :  { %p1427_p1 = scmp.lt.u32.totalorder %s1423_s25, %s1850_s1 }
   0x8   :  { %p1429_p2 = pnand %p1427_p1, %p1424_p0 }
   0xa   :  { %1432 = shalt.err (!%p1429_p2)
}
   0xb   :  { %s1433_s30 = scalar_lea.vmem %s34_s22, 1536  ;;  %p1438_p4 = scmp.lt.s32.totalorder %s34_s22, %s34_s22 }
   0xc   :  { %p1434_p3 = scmp.ne.s32.totalorder %s34_s22, %s1433_s30  ;;  %p1439_p5 = scmp.lt.s32.totalorder %s1433_s30, %s1433_s30 }
   0xe   :  { %p1440_p6 = por %p1439_p5, %p1438_p4 }
  0x10   :  { %p1441_p7 = pnand %p1440_p6, %p1434_p3 }
  0x12   :  { %1444 = shalt.err (!%p1441_p7)
}
  0x13   :  { %s1588_s7 = smov 64   ;;  %s1589_s8 = smov 4  }
  0x14   :  { %39 = dma.hbm_to_vmem [thread:$0]  %s1850_s1, 1536, %s34_s22, [#allocation7], %s1588_s7, %s1588_s7, %s1589_s8  }
  0x15   :  { %s1590_s11 = smov [#allocation9]   ;;  %s1591_s13 = smov [#allocation3]  }
  0x16   :  { %s57_s12 = sshll.u32 %s1590_s11, 4  ;;  %s21_s14 = sshll.u32 %s1591_s13, 4  ;;  %s58_s12 = int_to_ptr.vmem [resolvable:$true] %s57_s12  ;;  %s22_s14 = int_to_ptr.vmem [resolvable:$true] %s21_s14 }
  0x17   :  { %s1445_s17 = scalar_lea.hbm %s1852_s3, 256 }
  0x18   :  { %p1446_p8 = scmp.ne.s32.totalorder %s1852_s3, %s1445_s17  ;;  %p1449_p9 = scmp.lt.u32.totalorder %s1445_s17, %s1852_s3 }
  0x1a   :  { %p1451_p10 = pnand %p1449_p9, %p1446_p8 }
  0x1c   :  { %1454 = shalt.err (!%p1451_p10)
}
  0x1d   :  { %s1455_s1 = scalar_lea.vmem %s58_s12, 256  ;;  %p1460_p12 = scmp.lt.s32.totalorder %s58_s12, %s58_s12 }
  0x1e   :  { %p1456_p11 = scmp.ne.s32.totalorder %s58_s12, %s1455_s1  ;;  %p1461_p13 = scmp.lt.s32.totalorder %s1455_s1, %s1455_s1 }
  0x20   :  { %p1462_p0 = por %p1461_p13, %p1460_p12 }
  0x22   :  { %p1463_p1 = pnand %p1462_p0, %p1456_p11 }
  0x24   :  { %1466 = shalt.err (!%p1463_p1)
}
  0x25   :  { %63 = dma.hbm_to_vmem [thread:$0]  %s1852_s3, 256, %s58_s12, [#allocation10], %s1588_s7, %s1588_s7, %s1589_s8  }
  0x26   :  { %s1467_s26 = scalar_lea.hbm %s1849_s0, 3072 }
  0x27   :  { %p1468_p2 = scmp.ne.s32.totalorder %s1849_s0, %s1467_s26  ;;  %p1471_p3 = scmp.lt.u32.totalorder %s1467_s26, %s1849_s0 }
  0x29   :  { %p1473_p4 = pnand %p1471_p3, %p1468_p2 }
  0x2b   :  { %1476 = shalt.err (!%p1473_p4)
}
  0x2c   :  { %s1477_s9 = scalar_lea.vmem %s22_s14, 3072  ;;  %p1482_p6 = scmp.lt.s32.totalorder %s22_s14, %s22_s14 }
  0x2d   :  { %p1478_p5 = scmp.ne.s32.totalorder %s22_s14, %s1477_s9  ;;  %p1483_p7 = scmp.lt.s32.totalorder %s1477_s9, %s1477_s9 }
  0x2f   :  { %p1484_p8 = por %p1483_p7, %p1482_p6 }
  0x31   :  { %p1485_p9 = pnand %p1484_p8, %p1478_p5 }
  0x33   :  { %1488 = shalt.err (!%p1485_p9)
}
  0x34   :  { %s1592_s3 = smov 128   ;;  %s1593_s10 = smov 8  }
  0x35   :  { %27 = dma.hbm_to_vmem [thread:$0]  %s1849_s0, 3072, %s22_s14, [#allocation4], %s1592_s3, %s1592_s3, %s1593_s10  }
  0x36   :  { %s1594_s13 = smov [#allocation8]   ;;  %s1595_s16 = smov [#allocation11]  }
  0x37   :  { %s45_s15 = sshll.u32 %s1594_s13, 4  ;;  %s70_s17 = sshll.u32 %s1595_s16, 4  ;;  %s46_s15 = int_to_ptr.vmem [resolvable:$true] %s45_s15  ;;  %s71_s17 = int_to_ptr.vmem [resolvable:$true] %s70_s17 }
  0x38   :  { %s1489_s20 = scalar_lea.hbm %s1851_s2, 1024 }
  0x39   :  { %p1490_p10 = scmp.ne.s32.totalorder %s1851_s2, %s1489_s20  ;;  %p1493_p11 = scmp.lt.u32.totalorder %s1489_s20, %s1851_s2 }
  0x3b   :  { %p1495_p12 = pnand %p1493_p11, %p1490_p10 }
  0x3d   :  { %1498 = shalt.err (!%p1495_p12)
}
  0x3e   :  { %s1499_s0 = scalar_lea.vmem %s46_s15, 1024  ;;  %p1504_p0 = scmp.lt.s32.totalorder %s46_s15, %s46_s15 }
  0x3f   :  { %p1500_p13 = scmp.ne.s32.totalorder %s46_s15, %s1499_s0  ;;  %p1505_p1 = scmp.lt.s32.totalorder %s1499_s0, %s1499_s0 }
  0x41   :  { %p1506_p2 = por %p1505_p1, %p1504_p0 }
  0x43   :  { %p1507_p3 = pnand %p1506_p2, %p1500_p13 }
  0x45   :  { %1510 = shalt.err (!%p1507_p3)
}
  0x46   :  { %51 = dma.hbm_to_vmem [thread:$0]  %s1851_s2, 1024, %s46_s15, [#allocation7], %s1588_s7, %s1588_s7, %s1589_s8  }
  0x47   :  { %s1511_s27 = scalar_lea.hbm %s1853_s4, 16 }
  0x48   :  { %p1512_p4 = scmp.ne.s32.totalorder %s1853_s4, %s1511_s27  ;;  %p1515_p5 = scmp.lt.u32.totalorder %s1511_s27, %s1853_s4 }
  0x4a   :  { %p1517_p6 = pnand %p1515_p5, %p1512_p4 }
  0x4c   :  { %1520 = shalt.err (!%p1517_p6)
}
  0x4d   :  { %s1521_s11 = scalar_lea.vmem %s71_s17, 16  ;;  %s1525_s12 = scalar_lea.vmem %s71_s17, 32 }
  0x4e   :  { %p1522_p7 = scmp.ne.s32.totalorder %s71_s17, %s1521_s11  ;;  %p1526_p8 = scmp.lt.s32.totalorder %s71_s17, %s71_s17 }
  0x4f   :  { %p1527_p9 = scmp.lt.s32.totalorder %s1525_s12, %s1521_s11 }
  0x51   :  { %p1528_p10 = por %p1527_p9, %p1526_p8 }
  0x53   :  { %p1529_p11 = pnand %p1528_p10, %p1522_p7 }
  0x55   :  { %1532 = shalt.err (!%p1529_p11)
}
  0x56   :  { %73 = dma.hbm_to_vmem [thread:$0]  %s1853_s4, 16, %s71_s17, [#allocation10]  }
  0x57   :  { %s1596_s15 = smov [#allocation12]   ;;  %s1533_s20 = scalar_lea.hbm %s1854_s5, 256 }
  0x58   :  { %s79_s16 = sshll.u32 %s1596_s15, 4  ;;  %p1534_p12 = scmp.ne.s32.totalorder %s1854_s5, %s1533_s20  ;;  %s80_s16 = int_to_ptr.vmem [resolvable:$true] %s79_s16 }
  0x59   :  { %p1537_p13 = scmp.lt.u32.totalorder %s1533_s20, %s1854_s5 }
  0x5b   :  { %p1539_p0 = pnand %p1537_p13, %p1534_p12 }
  0x5d   :  { %1542 = shalt.err (!%p1539_p0)
}
  0x5e   :  { %s1543_s0 = scalar_lea.vmem %s80_s16, 256  ;;  %p1548_p2 = scmp.lt.s32.totalorder %s80_s16, %s80_s16 }
  0x5f   :  { %p1544_p1 = scmp.ne.s32.totalorder %s80_s16, %s1543_s0  ;;  %p1549_p3 = scmp.lt.s32.totalorder %s1543_s0, %s1543_s0 }
  0x61   :  { %p1550_p4 = por %p1549_p3, %p1548_p2 }
  0x63   :  { %p1551_p5 = pnand %p1550_p4, %p1544_p1 }
  0x65   :  { %1554 = shalt.err (!%p1551_p5)
}
  0x66   :  { %85 = dma.hbm_to_vmem [thread:$0]  %s1854_s5, 256, %s80_s16, [#allocation13], %s1588_s7, %s1588_s7, %s1589_s8  }
  0x67   :  { %1577 = dma.done.wait [#allocation4], 3072  }
  0x68   :  { %1578 = vsyncadd [#allocation4], 4294964224 }
  0x69   :  { %1579 = dma.done.wait [#allocation7], 2560  }
  0x6a   :  { %1580 = vsyncadd [#allocation7], 4294964736 }
  0x6b   :  { %1581 = dma.done.wait [#allocation10], 272  }
  0x6c   :  { %1582 = vsyncadd [#allocation10], 4294967024 }
  0x6d   :  { %1583 = dma.done.wait [#allocation13], 256  }
  0x6e   :  { %1584 = vsyncadd [#allocation13], 4294967040  ;;  %v1597_v0 = vmov 0   ;;  %v111_v1 = vld [vmem:[#allocation3 + $0x10] sm:$0xff]  ;;  %v109_v2 = vld [vmem:[#allocation3] sm:$0xff]  ;;  %vm407_vm0 = vcmask 261120   ;;  %v133_v47 = vlaneseq }
  0x6f   :  { %1350 = vset.pattern.permute.xlu1 %v1597_v0  ;;  %1349 = vset.pattern.permute.xlu0 %v1597_v0  ;;  %v112_v3 = vld [vmem:[#allocation3 + $0x18] sm:$0xff]  ;;  %v110_v4 = vld [vmem:[#allocation3 + $0x8] sm:$0xff]  ;;  %v113_v6 = vld [vmem:[#allocation3 + $0x20] sm:$0xff]  ;;  %v1598_v53 = vmov 1.0|1.0   ;;  %s1599_s5 = smov [#allocation14]  }
  0x70   :  { %142 = vperm.xlu1 %1350, %v111_v1   ;;  %136 = vperm.xlu0 %1349, %v109_v2   ;;  %v114_v5 = vld [vmem:[#allocation3 + $0x28] sm:$0xff]  ;;  %v116_v7 = vld [vmem:[#allocation3 + $0x38] sm:$0xff]  ;;  %v115_v8 = vld [vmem:[#allocation3 + $0x30] sm:$0xff]  ;;  %v1734_v50 = vand.u32 127, %v133_v47  ;;  %s1052_s7 = sshll.u32 %s1599_s5, 4  ;;  %s1053_s7 = int_to_ptr.vmem [resolvable:$true] %s1052_s7 }
  0x71   :  { %v1351_v9 = vld [vmem:[#allocation9] sm:$0xff]   ;;  %v1352_v10 = vld [vmem:[#allocation9 + $0x8] sm:$0xff]   ;;  %v1357_v16 = vld [vmem:[#allocation6 + $0x10] sm:$0xff]   ;;  %s1555_s8 = scalar_lea.vmem %s1053_s7, 3072  ;;  %p1560_p7 = scmp.lt.s32.totalorder %s1053_s7, %s1053_s7 }
  0x72   :  { %1212 = vmatprep.subr.bf16.mxu0 %v1351_v9  ;;  %v1353_v11 = vld [vmem:[#allocation6] sm:$0xff]   ;;  %1308 = vmatprep.subr.bf16.mxu1 %v1351_v9  ;;  %v118_v12 = vld [vmem:[#allocation3 + $0x48] sm:$0xff]  ;;  %v120_v18 = vld [vmem:[#allocation3 + $0x58] sm:$0xff]  ;;  %p1556_p6 = scmp.ne.s32.totalorder %s1053_s7, %s1555_s8  ;;  %p1561_p8 = scmp.lt.s32.totalorder %s1555_s8, %s1555_s8 }
  0x73   :  { %1213 = vmatpush3.bf16.msra.mxu0 %v1351_v9  ;;  %1310 = vmatpush3.bf16.msra.mxu1 %v1351_v9  ;;  %v1354_v13 = vld [vmem:[#allocation8] sm:$0xff]   ;;  %v1355_v15 = vld [vmem:[#allocation6 + $0x8] sm:$0xff]   ;;  %v119_v19 = vld [vmem:[#allocation3 + $0x50] sm:$0xff] }
  0x74   :  { %145 = vperm.xlu1 %1350, %v112_v3   ;;  %139 = vperm.xlu0 %1349, %v110_v4   ;;  %v117_v14 = vld [vmem:[#allocation3 + $0x40] sm:$0xff]  ;;  %v1356_v17 = vld [vmem:[#allocation8 + $0x8] sm:$0xff]   ;;  %v1358_v21 = vld [vmem:[#allocation8 + $0x10] sm:$0xff]   ;;  %p1562_p9 = por %p1561_p8, %p1560_p7 }
  0x75   :  { %1214 = vmatprep.subr.bf16.mxu0 %v1352_v10  ;;  %1216 = vmatprep.mubr.msk.bf16.mxu0 %vm407_vm0, %v1353_v11  ;;  %v122_v20 = vld [vmem:[#allocation3 + $0x68] sm:$0xff]  ;;  %v121_v22 = vld [vmem:[#allocation3 + $0x60] sm:$0xff]  ;;  %v1359_v23 = vld [vmem:[#allocation6 + $0x18] sm:$0xff]  }
  0x76   :  { %1309 = vmatprep.subr.bf16.mxu1 %v1352_v10  ;;  %v1361_v24 = vld [vmem:[#allocation6 + $0x20] sm:$0xff]   ;;  %v124_v25 = vld [vmem:[#allocation3 + $0x78] sm:$0xff]  ;;  %v123_v27 = vld [vmem:[#allocation3 + $0x70] sm:$0xff]  ;;  %p1563_p10 = pnand %p1562_p9, %p1556_p6 }
  0x77   :  { %1215 = vmatpush3.bf16.msra.mxu0 %v1352_v10  ;;  %1311 = vmatpush3.bf16.msra.mxu1 %v1352_v10  ;;  %v1360_v26 = vld [vmem:[#allocation8 + $0x18] sm:$0xff]   ;;  %v1362_v28 = vld [vmem:[#allocation8 + $0x20] sm:$0xff]   ;;  %v126_v29 = vld [vmem:[#allocation3 + $0x88] sm:$0xff] }
  0x78   :  { %151 = vperm.xlu1 %1350, %v114_v5   ;;  %148 = vperm.xlu0 %1349, %v113_v6   ;;  %v125_v30 = vld [vmem:[#allocation3 + $0x80] sm:$0xff]  ;;  %v1363_v31 = vld [vmem:[#allocation6 + $0x28] sm:$0xff]   ;;  %v1365_v32 = vld [vmem:[#allocation6 + $0x30] sm:$0xff]  }
  0x79   :  { %1240 = vmatprep.subr.bf16.mxu0 %v1354_v13  ;;  %v1364_v33 = vld [vmem:[#allocation8 + $0x28] sm:$0xff]   ;;  %v128_v34 = vld [vmem:[#allocation3 + $0x98] sm:$0xff]  ;;  %v127_v35 = vld [vmem:[#allocation3 + $0x90] sm:$0xff] }
  0x7a   :  { %1217 = vmatmul.mubr.msk.bf16.vlgmr.msra.gmra.mrb[0].mxu0 %vm407_vm0, %v1355_v15  ;;  %v1369_v36 = vld [vmem:[#allocation6 + $0x40] sm:$0xff]   ;;  %v1366_v37 = vld [vmem:[#allocation8 + $0x30] sm:$0xff]   ;;  %v1370_v38 = vld [vmem:[#allocation6 + $0x48] sm:$0xff]  }
  0x7b   :  { %1241 = vmatpush3.bf16.msra.mxu0 %v1354_v13  ;;  %1220 = vmatprep.mubr.msk.bf16.mxu0 %vm407_vm0, %v1357_v16  ;;  %v130_v39 = vld [vmem:[#allocation3 + $0xa8] sm:$0xff]  ;;  %v129_v40 = vld [vmem:[#allocation3 + $0xa0] sm:$0xff]  ;;  %v1367_v41 = vld [vmem:[#allocation6 + $0x38] sm:$0xff]  }
  0x7c   :  { %157 = vperm.xlu1 %1350, %v116_v7   ;;  %154 = vperm.xlu0 %1349, %v115_v8   ;;  %v1368_v42 = vld [vmem:[#allocation8 + $0x38] sm:$0xff]   ;;  %v131_v44 = vld [vmem:[#allocation3 + $0xb0] sm:$0xff] }
  0x7d   :  { %1242 = vmatprep.subr.bf16.mxu0 %v1356_v17  ;;  %1232 = vmatprep.mubr.msk.bf16.mxu1 %vm407_vm0, %v1369_v36  ;;  %v132_v43 = vld [vmem:[#allocation3 + $0xb8] sm:$0xff]  ;;  %v1371_v45 = vld [vmem:[#allocation6 + $0x50] sm:$0xff]  }
  0x7e   :  { %1233 = vmatmul.mubr.msk.bf16.vlgmr.msra.gmra.mrb[0].mxu1 %vm407_vm0, %v1370_v38  ;;  %v1372_v46 = vld [vmem:[#allocation6 + $0x58] sm:$0xff]  }
  0x7f   :  { %1243 = vmatpush3.bf16.msra.mxu0 %v1356_v17  ;;  %1236 = vmatprep.mubr.msk.bf16.mxu1 %vm407_vm0, %v1371_v45  ;;  %v1373_v10 = vld [vmem:[#allocation12] sm:$0xff]   ;;  %v1374_v11 = vld [vmem:[#allocation12 + $0x8] sm:$0xff]  }
  0x80   :  { %163 = vperm.xlu1 %1350, %v118_v12   ;;  %160 = vperm.xlu0 %1349, %v117_v14  }
  0x81   :  { %1244 = vmatprep.subr.bf16.mxu0 %v1358_v21  ;;  %1280 = vmatprep.subr.bf16.mxu1 %v1373_v10 }
  0x82   :  { %1221 = vmatmul.mubr.msk.bf16.gmra.mrb[4].mxu0 %vm407_vm0, %v1359_v23  ;;  %1281 = vmatpush3.bf16.msra.mxu1 %v1373_v10 }
  0x83   :  { %1245 = vmatpush3.bf16.msra.mxu0 %v1358_v21  ;;  %1224 = vmatprep.mubr.msk.bf16.mxu0 %vm407_vm0, %v1361_v24 }
  0x84   :  { %169 = vperm.xlu1 %1350, %v120_v18   ;;  %166 = vperm.xlu0 %1349, %v119_v19  }
  0x85   :  { %1246 = vmatprep.subr.bf16.mxu0 %v1360_v26  ;;  %1282 = vmatprep.subr.bf16.mxu1 %v1374_v11 }
  0x86   :  { %1237 = vmatmul.mubr.msk.bf16.gmra.mrb[4].mxu1 %vm407_vm0, %v1372_v46 }
  0x87   :  { %1247 = vmatpush3.bf16.msra.mxu0 %v1360_v26  ;;  %1283 = vmatpush3.bf16.msra.mxu1 %v1374_v11 }
  0x88   :  { %175 = vperm.xlu1 %1350, %v122_v20   ;;  %172 = vperm.xlu0 %1349, %v121_v22   ;;  %v1776_v20 = vld [vmem:[#allocation11] ss:$0 sm:$0xff] }
  0x89   :  { %1248 = vmatprep.subr.bf16.mxu0 %v1362_v28 }
  0x8a   :  { %1225 = vmatmul.mubr.msk.bf16.gmra.mrb[8].mxu0 %vm407_vm0, %v1363_v31 }
  0x8b   :  { %1249 = vmatpush3.bf16.msra.mxu0 %v1362_v28  ;;  %1228 = vmatprep.mubr.msk.bf16.mxu0 %vm407_vm0, %v1365_v32 }
  0x8c   :  { %181 = vperm.xlu1 %1350, %v124_v25   ;;  %178 = vperm.xlu0 %1349, %v123_v27  }
  0x8d   :  { %1250 = vmatprep.subr.bf16.mxu0 %v1364_v33 }
  0x8f   :  { %1251 = vmatpush3.bf16.msra.mxu0 %v1364_v33 }
  0x90   :  { %187 = vperm.xlu1 %1350, %v126_v29   ;;  %184 = vperm.xlu0 %1349, %v125_v30  }
  0x91   :  { %1252 = vmatprep.subr.bf16.mxu0 %v1366_v37 }
  0x92   :  { %1229 = vmatmul.mubr.msk.bf16.gmra.mrb[12].mxu0 %vm407_vm0, %v1367_v41 }
  0x93   :  { %1253 = vmatpush3.bf16.msra.mxu0 %v1366_v37 }
  0x94   :  { %193 = vperm.xlu1 %1350, %v128_v34   ;;  %190 = vperm.xlu0 %1349, %v127_v35  }
  0x95   :  { %1254 = vmatprep.subr.bf16.mxu0 %v1368_v42 }
  0x97   :  { %1255 = vmatpush3.bf16.msra.mxu0 %v1368_v42 }
  0x98   :  { %199 = vperm.xlu1 %1350, %v130_v39   ;;  %196 = vperm.xlu0 %1349, %v129_v40  }
  0x9c   :  { %205 = vperm.xlu1 %1350, %v132_v43   ;;  %202 = vperm.xlu0 %1349, %v131_v44  }
  0xef   :  { %v143_v48 = vpop.permute.xlu1 %142  ;;  %v137_v49 = vpop.permute.xlu0 %136 }
  0xf0   :  { %vm209_vm1 = vcmp.eq.s32.totalorder %v143_v48, %v1734_v50  ;;  %vm207_vm4 = vcmp.eq.s32.totalorder %v137_v49, %v1734_v50 }
  0xf3   :  { %v146_v51 = vpop.permute.xlu1 %145  ;;  %v140_v52 = vpop.permute.xlu0 %139 }
  0xf4   :  { %vm210_vm2 = vcmp.eq.s32.totalorder %v146_v51, %v1734_v50  ;;  %vm208_vm3 = vcmp.eq.s32.totalorder %v140_v52, %v1734_v50 }
  0xf5   :  { %vm1127_vm5 = vmpackc.low %vm210_vm2, %vm209_vm1 }
  0xf6   :  { %vm1125_vm6 = vmpackc.low %vm208_vm3, %vm207_vm4 }
  0xf7   :  { %1256 = vmatprep.mubr.msk.bf16.mxu0 %vm1125_vm6, %v1598_v53  ;;  %v152_v54 = vpop.permute.xlu1 %151  ;;  %v149_v55 = vpop.permute.xlu0 %148 }
  0xf8   :  { %vm212_vm7 = vcmp.eq.s32.totalorder %v152_v54, %v1734_v50  ;;  %1257 = vmatmul.mubr.msk.bf16.vlgmr.msra.gmra.mrb[0].mxu0 %vm1127_vm5, %v1598_v53  ;;  %vm211_vm8 = vcmp.eq.s32.totalorder %v149_v55, %v1734_v50 }
  0xf9   :  { %vm1129_vm9 = vmpackc.low %vm212_vm7, %vm211_vm8 }
  0xfa   :  { %1260 = vmatprep.mubr.msk.bf16.mxu0 %vm1129_vm9, %v1598_v53 }
  0xfb   :  { %v158_v56 = vpop.permute.xlu1 %157  ;;  %v155_v57 = vpop.permute.xlu0 %154 }
  0xfc   :  { %vm214_vm10 = vcmp.eq.s32.totalorder %v158_v56, %v1734_v50  ;;  %vm213_vm11 = vcmp.eq.s32.totalorder %v155_v57, %v1734_v50 }
  0xfd   :  { %vm1131_vm12 = vmpackc.low %vm214_vm10, %vm213_vm11 }
  0xff   :  { %v164_v58 = vpop.permute.xlu1 %163  ;;  %v161_v59 = vpop.permute.xlu0 %160 }
 0x100   :  { %vm216_vm13 = vcmp.eq.s32.totalorder %v164_v58, %v1734_v50  ;;  %1261 = vmatmul.mubr.msk.bf16.gmra.mrb[4].mxu0 %vm1131_vm12, %v1598_v53  ;;  %vm215_vm14 = vcmp.eq.s32.totalorder %v161_v59, %v1734_v50 }
 0x101   :  { %vm1133_vm15 = vmpackc.low %vm216_vm13, %vm215_vm14 }
 0x102   :  { %1264 = vmatprep.mubr.msk.bf16.mxu0 %vm1133_vm15, %v1598_v53 }
 0x103   :  { %v170_v60 = vpop.permute.xlu1 %169  ;;  %v167_v61 = vpop.permute.xlu0 %166 }
 0x104   :  { %vm218_vm1 = vcmp.eq.s32.totalorder %v170_v60, %v1734_v50  ;;  %vm217_vm2 = vcmp.eq.s32.totalorder %v167_v61, %v1734_v50 }
 0x105   :  { %vm1135_vm3 = vmpackc.low %vm218_vm1, %vm217_vm2 }
 0x107   :  { %v176_v62 = vpop.permute.xlu1 %175  ;;  %v173_v63 = vpop.permute.xlu0 %172 }
 0x108   :  { %vm220_vm4 = vcmp.eq.s32.totalorder %v176_v62, %v1734_v50  ;;  %1265 = vmatmul.mubr.msk.bf16.gmra.mrb[8].mxu0 %vm1135_vm3, %v1598_v53  ;;  %vm219_vm5 = vcmp.eq.s32.totalorder %v173_v63, %v1734_v50 }
 0x109   :  { %vm1137_vm6 = vmpackc.low %vm220_vm4, %vm219_vm5 }
 0x10a   :  { %1268 = vmatprep.mubr.msk.bf16.mxu0 %vm1137_vm6, %v1598_v53 }
 0x10b   :  { %v182_v0 = vpop.permute.xlu1 %181  ;;  %v179_v1 = vpop.permute.xlu0 %178 }
 0x10c   :  { %vm222_vm7 = vcmp.eq.s32.totalorder %v182_v0, %v1734_v50  ;;  %vm221_vm8 = vcmp.eq.s32.totalorder %v179_v1, %v1734_v50 }
 0x10d   :  { %vm1139_vm9 = vmpackc.low %vm222_vm7, %vm221_vm8 }
 0x10f   :  { %v188_v2 = vpop.permute.xlu1 %187  ;;  %v185_v3 = vpop.permute.xlu0 %184 }
 0x110   :  { %vm224_vm10 = vcmp.eq.s32.totalorder %v188_v2, %v1734_v50  ;;  %1269 = vmatmul.mubr.msk.bf16.gmra.mrb[12].mxu0 %vm1139_vm9, %v1598_v53  ;;  %vm223_vm11 = vcmp.eq.s32.totalorder %v185_v3, %v1734_v50 }
 0x111   :  { %vm1141_vm12 = vmpackc.low %vm224_vm10, %vm223_vm11 }
 0x112   :  { %1272 = vmatprep.mubr.msk.bf16.mxu0 %vm1141_vm12, %v1598_v53 }
 0x113   :  { %v194_v4 = vpop.permute.xlu1 %193  ;;  %v191_v5 = vpop.permute.xlu0 %190 }
 0x114   :  { %vm226_vm13 = vcmp.eq.s32.totalorder %v194_v4, %v1734_v50  ;;  %vm225_vm14 = vcmp.eq.s32.totalorder %v191_v5, %v1734_v50 }
 0x115   :  { %vm1143_vm15 = vmpackc.low %vm226_vm13, %vm225_vm14 }
 0x117   :  { %v200_v6 = vpop.permute.xlu1 %199  ;;  %v197_v7 = vpop.permute.xlu0 %196 }
 0x118   :  { %vm228_vm1 = vcmp.eq.s32.totalorder %v200_v6, %v1734_v50  ;;  %1273 = vmatmul.mubr.msk.bf16.gmra.mrb[16].mxu0 %vm1143_vm15, %v1598_v53  ;;  %vm227_vm2 = vcmp.eq.s32.totalorder %v197_v7, %v1734_v50 }
 0x119   :  { %vm1145_vm3 = vmpackc.low %vm228_vm1, %vm227_vm2 }
 0x11a   :  { %1276 = vmatprep.mubr.msk.bf16.mxu0 %vm1145_vm3, %v1598_v53 }
 0x11b   :  { %v206_v8 = vpop.permute.xlu1 %205  ;;  %v203_v9 = vpop.permute.xlu0 %202 }
 0x11c   :  { %vm230_vm4 = vcmp.eq.s32.totalorder %v206_v8, %v1734_v50  ;;  %vm229_vm5 = vcmp.eq.s32.totalorder %v203_v9, %v1734_v50 }
 0x11d   :  { %vm1147_vm6 = vmpackc.low %vm230_vm4, %vm229_vm5 }
 0x120   :  { %1277 = vmatmul.mubr.msk.bf16.gmra.mrb[20].mxu0 %vm1147_vm6, %v1598_v53 }
 0x151   :  { %v1760_v12 = vpop.f32.mrb[0].mxu1 }
 0x152   :  { %v1762_v13 = vpop.f32.mrb[1].mxu1 }
 0x153   :  { %v1764_v14 = vpop.f32.mrb[2].mxu1 }
 0x154   :  { %v1766_v15 = vpop.f32.mrb[3].mxu1 }
 0x159   :  { %v1768_v16 = vpop.f32.mrb[4].mxu1 }
 0x15a   :  { %v1770_v17 = vpop.f32.mrb[5].mxu1 }
 0x15b   :  { %v1772_v18 = vpop.f32.mrb[6].mxu1 }
 0x15c   :  { %v1774_v19 = vpop.f32.mrb[7].mxu1 }
 0x1cb   :  { %v1258_v21 = vpop.f32.mrb[0].mxu0 }
 0x1cc   :  { %v759_v22 = vadd.f32 %v1258_v21, %v1776_v20  ;;  %v655_v23 = vpop.f32.mrb[1].mxu0 }
 0x1cd   :  { %v757_v24 = vadd.f32 %v1776_v20, %v655_v23  ;;  %v1259_v25 = vpop.f32.mrb[2].mxu0 }
 0x1ce   :  { %1375 = vtanh.f32 %v759_v22  ;;  %v760_v26 = vadd.f32 %v1259_v25, %v1776_v20  ;;  %v658_v27 = vpop.f32.mrb[3].mxu0 }
 0x1cf   :  { %1377 = vtanh.f32 %v757_v24  ;;  %v758_v28 = vadd.f32 %v1776_v20, %v658_v27 }
 0x1d0   :  { %1379 = vtanh.f32 %v760_v26 }
 0x1d1   :  { %1381 = vtanh.f32 %v758_v28 }
 0x1d3   :  { %v1262_v29 = vpop.f32.mrb[4].mxu0 }
 0x1d4   :  { %v763_v30 = vadd.f32 %v1262_v29, %v1776_v20  ;;  %v671_v31 = vpop.f32.mrb[5].mxu0 }
 0x1d5   :  { %v761_v32 = vadd.f32 %v1776_v20, %v671_v31  ;;  %v1263_v33 = vpop.f32.mrb[6].mxu0 }
 0x1d6   :  { %1383 = vtanh.f32 %v763_v30  ;;  %v764_v34 = vadd.f32 %v1263_v33, %v1776_v20  ;;  %v674_v35 = vpop.f32.mrb[7].mxu0 }
 0x1d7   :  { %1385 = vtanh.f32 %v761_v32  ;;  %v762_v36 = vadd.f32 %v1776_v20, %v674_v35 }
 0x1d8   :  { %v1376_v37 = vpop.eup %1375  ;;  %1387 = vtanh.f32 %v764_v34 }
 0x1d9   :  { %v1378_v38 = vpop.eup %1377  ;;  %1389 = vtanh.f32 %v762_v36 }
 0x1da   :  { %v1380_v39 = vpop.eup %1379 }
 0x1db   :  { %v1382_v40 = vpop.eup %1381  ;;  %v806_v41 = vpack.c.bf16 %v1380_v39, %v1376_v37  ;;  %v1266_v42 = vpop.f32.mrb[8].mxu0 }
 0x1dc   :  { %v805_v43 = vpack.c.bf16 %v1382_v40, %v1378_v38  ;;  %v767_v44 = vadd.f32 %v1266_v42, %v1776_v20  ;;  %v687_v45 = vpop.f32.mrb[9].mxu0 }
 0x1dd   :  { %818 = vst.msk [vmem:[#allocation2 + $0x8] sm:$0xff] %vm407_vm0, %v806_v41  ;;  %v765_v46 = vadd.f32 %v1776_v20, %v687_v45  ;;  %v1267_v47 = vpop.f32.mrb[10].mxu0 }
 0x1de   :  { %817 = vst.msk [vmem:[#allocation2] sm:$0xff] %vm407_vm0, %v805_v43  ;;  %1391 = vtanh.f32 %v767_v44  ;;  %v768_v48 = vadd.f32 %v1267_v47, %v1776_v20  ;;  %v690_v49 = vpop.f32.mrb[11].mxu0 }
 0x1df   :  { %1393 = vtanh.f32 %v765_v46  ;;  %v766_v50 = vadd.f32 %v1776_v20, %v690_v49 }
 0x1e0   :  { %v1384_v51 = vpop.eup %1383  ;;  %1395 = vtanh.f32 %v768_v48 }
 0x1e1   :  { %v1386_v52 = vpop.eup %1385  ;;  %1397 = vtanh.f32 %v766_v50 }
 0x1e2   :  { %v1388_v53 = vpop.eup %1387 }
 0x1e3   :  { %v1390_v54 = vpop.eup %1389  ;;  %v808_v55 = vpack.c.bf16 %v1388_v53, %v1384_v51  ;;  %v1270_v56 = vpop.f32.mrb[12].mxu0 }
 0x1e4   :  { %v807_v57 = vpack.c.bf16 %v1390_v54, %v1386_v52  ;;  %v771_v58 = vadd.f32 %v1270_v56, %v1776_v20  ;;  %v703_v59 = vpop.f32.mrb[13].mxu0  ;;  %v830_v1 = vld [vmem:[#allocation2 + $0x8] sm:$0xff] }
 0x1e5   :  { %820 = vst.msk [vmem:[#allocation2 + $0x18] sm:$0xff] %vm407_vm0, %v808_v55  ;;  %v769_v60 = vadd.f32 %v1776_v20, %v703_v59  ;;  %v1271_v61 = vpop.f32.mrb[14].mxu0  ;;  %v829_v62 = vld [vmem:[#allocation2] sm:$0xff] }
 0x1e6   :  { %819 = vst.msk [vmem:[#allocation2 + $0x10] sm:$0xff] %vm407_vm0, %v807_v57  ;;  %1399 = vtanh.f32 %v771_v58  ;;  %v772_v63 = vadd.f32 %v1271_v61, %v1776_v20  ;;  %v706_v0 = vpop.f32.mrb[15].mxu0  ;;  %1284 = vmatprep.mubr.msk.bf16.mxu1 %vm407_vm0, %v829_v62 }
 0x1e7   :  { %1401 = vtanh.f32 %v769_v60  ;;  %v770_v2 = vadd.f32 %v1776_v20, %v706_v0  ;;  %1285 = vmatmul.mubr.msk.bf16.vlgmr.msra.gmra.mrb[8].mxu1 %vm407_vm0, %v830_v1 }
 0x1e8   :  { %v1392_v3 = vpop.eup %1391  ;;  %1403 = vtanh.f32 %v772_v63 }
 0x1e9   :  { %v1394_v4 = vpop.eup %1393  ;;  %1405 = vtanh.f32 %v770_v2 }
 0x1ea   :  { %v1396_v5 = vpop.eup %1395 }
 0x1eb   :  { %v1398_v6 = vpop.eup %1397  ;;  %v810_v7 = vpack.c.bf16 %v1396_v5, %v1392_v3  ;;  %v1274_v8 = vpop.f32.mrb[16].mxu0 }
 0x1ec   :  { %v809_v9 = vpack.c.bf16 %v1398_v6, %v1394_v4  ;;  %v728_v10 = vadd.f32 %v1274_v8, %v1760_v12  ;;  %v719_v11 = vpop.f32.mrb[17].mxu0  ;;  %v832_v27 = vld [vmem:[#allocation2 + $0x18] sm:$0xff] }
 0x1ed   :  { %822 = vst.msk [vmem:[#allocation2 + $0x28] sm:$0xff] %vm407_vm0, %v810_v7  ;;  %v720_v21 = vadd.f32 %v719_v11, %v1762_v13  ;;  %v1275_v22 = vpop.f32.mrb[18].mxu0  ;;  %v831_v23 = vld [vmem:[#allocation2 + $0x10] sm:$0xff] }
 0x1ee   :  { %821 = vst.msk [vmem:[#allocation2 + $0x20] sm:$0xff] %vm407_vm0, %v809_v9  ;;  %v775_v24 = vadd.f32 %v1776_v20, %v728_v10  ;;  %v731_v25 = vadd.f32 %v1275_v22, %v1764_v14  ;;  %v722_v26 = vpop.f32.mrb[19].mxu0  ;;  %1288 = vmatprep.mubr.msk.bf16.mxu1 %vm407_vm0, %v831_v23 }
 0x1ef   :  { %v773_v28 = vadd.f32 %v1776_v20, %v720_v21  ;;  %v723_v12 = vadd.f32 %v722_v26, %v1766_v15  ;;  %1289 = vmatmul.mubr.msk.bf16.gmra.mrb[12].mxu1 %vm407_vm0, %v832_v27 }
 0x1f0   :  { %v1400_v29 = vpop.eup %1399  ;;  %1407 = vtanh.f32 %v775_v24  ;;  %v776_v13 = vadd.f32 %v1776_v20, %v731_v25 }
 0x1f1   :  { %v1402_v30 = vpop.eup %1401  ;;  %1409 = vtanh.f32 %v773_v28  ;;  %v774_v31 = vadd.f32 %v1776_v20, %v723_v12 }
 0x1f2   :  { %v1404_v32 = vpop.eup %1403  ;;  %1411 = vtanh.f32 %v776_v13 }
 0x1f3   :  { %v1406_v14 = vpop.eup %1405  ;;  %v812_v33 = vpack.c.bf16 %v1404_v32, %v1400_v29  ;;  %1413 = vtanh.f32 %v774_v31  ;;  %v1278_v34 = vpop.f32.mrb[20].mxu0 }
 0x1f4   :  { %v811_v35 = vpack.c.bf16 %v1406_v14, %v1402_v30  ;;  %v744_v36 = vadd.f32 %v1278_v34, %v1768_v16  ;;  %v735_v15 = vpop.f32.mrb[21].mxu0  ;;  %v834_v43 = vld [vmem:[#allocation2 + $0x28] sm:$0xff] }
 0x1f5   :  { %824 = vst.msk [vmem:[#allocation2 + $0x38] sm:$0xff] %vm407_vm0, %v812_v33  ;;  %v736_v37 = vadd.f32 %v735_v15, %v1770_v17  ;;  %v1279_v38 = vpop.f32.mrb[22].mxu0  ;;  %v833_v39 = vld [vmem:[#allocation2 + $0x20] sm:$0xff] }
 0x1f6   :  { %823 = vst.msk [vmem:[#allocation2 + $0x30] sm:$0xff] %vm407_vm0, %v811_v35  ;;  %v779_v40 = vadd.f32 %v1776_v20, %v744_v36  ;;  %v747_v41 = vadd.f32 %v1279_v38, %v1772_v18  ;;  %v738_v42 = vpop.f32.mrb[23].mxu0  ;;  %1292 = vmatprep.mubr.msk.bf16.mxu1 %vm407_vm0, %v833_v39 }
 0x1f7   :  { %v777_v44 = vadd.f32 %v1776_v20, %v736_v37  ;;  %v739_v16 = vadd.f32 %v738_v42, %v1774_v19  ;;  %1293 = vmatmul.mubr.msk.bf16.gmra.mrb[16].mxu1 %vm407_vm0, %v834_v43 }
 0x1f8   :  { %1415 = vtanh.f32 %v779_v40  ;;  %v780_v17 = vadd.f32 %v1776_v20, %v747_v41 }
 0x1f9   :  { %1417 = vtanh.f32 %v777_v44  ;;  %v778_v45 = vadd.f32 %v1776_v20, %v739_v16 }
 0x1fa   :  { %v1408_v46 = vpop.eup %1407  ;;  %1419 = vtanh.f32 %v780_v17 }
 0x1fb   :  { %v1410_v47 = vpop.eup %1409  ;;  %1421 = vtanh.f32 %v778_v45 }
 0x1fc   :  { %v1412_v18 = vpop.eup %1411  ;;  %v836_v19 = vld [vmem:[#allocation2 + $0x38] sm:$0xff] }
 0x1fd   :  { %v1414_v48 = vpop.eup %1413  ;;  %v814_v49 = vpack.c.bf16 %v1412_v18, %v1408_v46  ;;  %v835_v50 = vld [vmem:[#allocation2 + $0x30] sm:$0xff] }
 0x1fe   :  { %v813_v51 = vpack.c.bf16 %v1414_v48, %v1410_v47  ;;  %1296 = vmatprep.mubr.msk.bf16.mxu1 %vm407_vm0, %v835_v50 }
 0x1ff   :  { %826 = vst.msk [vmem:[#allocation2 + $0x48] sm:$0xff] %vm407_vm0, %v814_v49  ;;  %1297 = vmatmul.mubr.msk.bf16.gmra.mrb[20].mxu1 %vm407_vm0, %v836_v19 }
 0x200   :  { %825 = vst.msk [vmem:[#allocation2 + $0x40] sm:$0xff] %vm407_vm0, %v813_v51 }
 0x202   :  { %v1416_v52 = vpop.eup %1415 }
 0x203   :  { %v1418_v20 = vpop.eup %1417 }
 0x204   :  { %v1420_v53 = vpop.eup %1419 }
 0x205   :  { %v1422_v54 = vpop.eup %1421  ;;  %v816_v55 = vpack.c.bf16 %v1420_v53, %v1416_v52 }
 0x206   :  { %v815_v56 = vpack.c.bf16 %v1422_v54, %v1418_v20  ;;  %v838_v58 = vld [vmem:[#allocation2 + $0x48] sm:$0xff] }
 0x207   :  { %828 = vst.msk [vmem:[#allocation2 + $0x58] sm:$0xff] %vm407_vm0, %v816_v55  ;;  %v837_v57 = vld [vmem:[#allocation2 + $0x40] sm:$0xff] }
 0x208   :  { %827 = vst.msk [vmem:[#allocation2 + $0x50] sm:$0xff] %vm407_vm0, %v815_v56  ;;  %1300 = vmatprep.mubr.msk.bf16.mxu1 %vm407_vm0, %v837_v57 }
 0x209   :  { %1301 = vmatmul.mubr.msk.bf16.gmra.mrb[24].mxu1 %vm407_vm0, %v838_v58 }
 0x20e   :  { %v840_v60 = vld [vmem:[#allocation2 + $0x58] sm:$0xff] }
 0x20f   :  { %v839_v59 = vld [vmem:[#allocation2 + $0x50] sm:$0xff] }
 0x210   :  { %1304 = vmatprep.mubr.msk.bf16.mxu1 %vm407_vm0, %v839_v59 }
 0x211   :  { %1305 = vmatmul.mubr.msk.bf16.gmra.mrb[28].mxu1 %vm407_vm0, %v840_v60 }
 0x2ba   :  { %v1286_v61 = vpop.f32.mrb[8].mxu1 }
 0x2bb   :  { %1025 = vst [vmem:[#allocation14 + $0x10] sm:$0xff] %v1286_v61  ;;  %v928_v62 = vpop.f32.mrb[9].mxu1 }
 0x2bc   :  { %1023 = vst [vmem:[#allocation14] sm:$0xff] %v928_v62  ;;  %v1287_v63 = vpop.f32.mrb[10].mxu1 }
 0x2bd   :  { %1026 = vst [vmem:[#allocation14 + $0x18] sm:$0xff] %v1287_v63  ;;  %v931_v0 = vpop.f32.mrb[11].mxu1 }
 0x2be   :  { %1024 = vst [vmem:[#allocation14 + $0x8] sm:$0xff] %v931_v0 }
 0x2c2   :  { %v1290_v1 = vpop.f32.mrb[12].mxu1 }
 0x2c3   :  { %1029 = vst [vmem:[#allocation14 + $0x30] sm:$0xff] %v1290_v1  ;;  %v944_v2 = vpop.f32.mrb[13].mxu1 }
 0x2c4   :  { %1027 = vst [vmem:[#allocation14 + $0x20] sm:$0xff] %v944_v2  ;;  %v1291_v3 = vpop.f32.mrb[14].mxu1 }
 0x2c5   :  { %1030 = vst [vmem:[#allocation14 + $0x38] sm:$0xff] %v1291_v3  ;;  %v947_v4 = vpop.f32.mrb[15].mxu1 }
 0x2c6   :  { %1028 = vst [vmem:[#allocation14 + $0x28] sm:$0xff] %v947_v4 }
 0x2ca   :  { %v1294_v5 = vpop.f32.mrb[16].mxu1 }
 0x2cb   :  { %1033 = vst [vmem:[#allocation14 + $0x50] sm:$0xff] %v1294_v5  ;;  %v960_v6 = vpop.f32.mrb[17].mxu1 }
 0x2cc   :  { %1031 = vst [vmem:[#allocation14 + $0x40] sm:$0xff] %v960_v6  ;;  %v1295_v7 = vpop.f32.mrb[18].mxu1 }
 0x2cd   :  { %1034 = vst [vmem:[#allocation14 + $0x58] sm:$0xff] %v1295_v7  ;;  %v963_v8 = vpop.f32.mrb[19].mxu1 }
 0x2ce   :  { %1032 = vst [vmem:[#allocation14 + $0x48] sm:$0xff] %v963_v8 }
 0x2d2   :  { %v1298_v9 = vpop.f32.mrb[20].mxu1 }
 0x2d3   :  { %1037 = vst [vmem:[#allocation14 + $0x70] sm:$0xff] %v1298_v9  ;;  %v976_v10 = vpop.f32.mrb[21].mxu1 }
 0x2d4   :  { %1035 = vst [vmem:[#allocation14 + $0x60] sm:$0xff] %v976_v10  ;;  %v1299_v11 = vpop.f32.mrb[22].mxu1 }
 0x2d5   :  { %1038 = vst [vmem:[#allocation14 + $0x78] sm:$0xff] %v1299_v11  ;;  %v979_v21 = vpop.f32.mrb[23].mxu1 }
 0x2d6   :  { %1036 = vst [vmem:[#allocation14 + $0x68] sm:$0xff] %v979_v21 }
 0x2dc   :  { %v1302_v22 = vpop.f32.mrb[24].mxu1 }
 0x2dd   :  { %1041 = vst [vmem:[#allocation14 + $0x90] sm:$0xff] %v1302_v22  ;;  %v992_v23 = vpop.f32.mrb[25].mxu1 }
 0x2de   :  { %1039 = vst [vmem:[#allocation14 + $0x80] sm:$0xff] %v992_v23  ;;  %v1303_v24 = vpop.f32.mrb[26].mxu1 }
 0x2df   :  { %1042 = vst [vmem:[#allocation14 + $0x98] sm:$0xff] %v1303_v24  ;;  %v995_v25 = vpop.f32.mrb[27].mxu1 }
 0x2e0   :  { %1040 = vst [vmem:[#allocation14 + $0x88] sm:$0xff] %v995_v25 }
 0x2e4   :  { %v1306_v26 = vpop.f32.mrb[28].mxu1 }
 0x2e5   :  { %1045 = vst [vmem:[#allocation14 + $0xb0] sm:$0xff] %v1306_v26  ;;  %v1008_v27 = vpop.f32.mrb[29].mxu1 }
 0x2e6   :  { %1043 = vst [vmem:[#allocation14 + $0xa0] sm:$0xff] %v1008_v27  ;;  %v1307_v28 = vpop.f32.mrb[30].mxu1 }
 0x2e7   :  { %1046 = vst [vmem:[#allocation14 + $0xb8] sm:$0xff] %v1307_v28  ;;  %v1011_v12 = vpop.f32.mrb[31].mxu1 }
 0x2e8   :  { %1044 = vst [vmem:[#allocation14 + $0xa8] sm:$0xff] %v1011_v12 }
 0x2e9   :  { %1566 = shalt.err (!%p1563_p10)
}
 0x2ea   :  { %s1567_s25 = scalar_lea.hbm %s1855_s6, 3072 }
 0x2eb   :  { %p1568_p11 = scmp.ne.s32.totalorder %s1855_s6, %s1567_s25  ;;  %p1571_p12 = scmp.lt.u32.totalorder %s1567_s25, %s1855_s6 }
 0x2ed   :  { %p1573_p13 = pnand %p1571_p12, %p1568_p11 }
 0x2ef   :  { %1576 = shalt.err (!%p1573_p13)
}
 0x2f0   :  { %1058 = dma.vmem_to_hbm [thread:$0]  %s1053_s7, 3072, %s1855_s6, [#allocation5], %s1592_s3, %s1592_s3, %s1593_s10  }
 0x2f1   :  { %1585 = dma.done.wait [#allocation5], 3072  }
 0x2f2   :  { %1586 = vsyncadd [#allocation5], 4294964224 }
 0x2f3   :  { %1062 = vsyncpa [#allocation4], 1 }
 0x2f4   :  { %1063 = vsyncpa [#allocation7], 1 }
 0x2f5   :  { %1064 = vsyncpa [#allocation10], 1 }
 0x2f6   :  { %1065 = vsyncpa [#allocation13], 1 }
 0x2f7   :  { %1066 = vsyncpa [#allocation5], 1 }

</bundles_post_ra>
